<compile_context>
chip_gen: v6e
topology: v6e:2x2x1
jax: 0.10.0
libtpu: 0.0.40
codegen_flags: <defaults>
</compile_context>

<pallas_src>
import jax
import jax.numpy as jnp
import numpy as np
from jax.experimental import pallas as pl
from jax.experimental.pallas import tpu as pltpu


# -----------------------------------------------------------------------------
# Pallas kernel: fused Linear -> Tanh -> Linear, tiled over the output dim.
# One grid step = (branch b, output tile j):
#   out[:, j*tn:(j+1)*tn] = tanh(x @ W1 + b1) @ W2[:, tile] + b2[tile]
# x is the wte table itself ([S, D]); the batch dim is broadcast outside.
# -----------------------------------------------------------------------------
def _fused_prompt_mlp_kernel(wte_ref, w1_ref, b1_ref, w2_ref, b2_ref, o_ref):
    x = wte_ref[...]                                              # (S, D)  bf16
    h = jnp.tanh(
        jnp.dot(x, w1_ref[...], preferred_element_type=jnp.float32)
        + b1_ref[...]
    )                                                             # (S, mid) f32
    h = h.astype(w2_ref.dtype)                                    # bf16 for MXU
    o_ref[...] = (
        jnp.dot(h, w2_ref[...], preferred_element_type=jnp.float32)
        + b2_ref[...]
    ).astype(o_ref.dtype)                                         # (S, tn) f32


def _choose_tile_n(out_dim, mid_pad, S, w_bytes, budget_bytes=40 * 1024 * 1024):
    """Largest multiple-of-128 output tile whose double-buffered w2/out/b2
    tiles fit the VMEM budget (v7x-safe); full O if it already fits."""
    if out_dim <= 128:
        return out_dim
    per_col = 2 * mid_pad * w_bytes + 2 * S * 4 + 2 * 4   # w2 + out + b2, x2 bufs
    max_cols = budget_bytes // max(per_col, 1)
    tn = min(out_dim, max(128, (max_cols // 128) * 128))
    return tn


def fused_prompt_mlp(wte_all, w1_all, b1_all, w2_all, b2_all):
    """All three branches (enc/dec/cross) in one pallas_call.

    wte_all: [3, S, D] bf16     w1_all: [3, D, mid_pad] bf16
    b1_all:  [3, 1, mid_pad] f32
    w2_all:  [3, mid_pad, O] bf16   b2_all: [3, 1, O] f32   ->   [3, S, O] f32
    """
    n_branch, S, D = wte_all.shape
    mid_pad = w1_all.shape[2]
    O = w2_all.shape[2]
    w_bytes = jnp.dtype(w2_all.dtype).itemsize

    tn = _choose_tile_n(O, mid_pad, S, w_bytes)
    n_j = pl.cdiv(O, tn)

    return pl.pallas_call(
        _fused_prompt_mlp_kernel,
        out_shape=jax.ShapeDtypeStruct((n_branch, S, O), jnp.float32),
        grid=(n_branch, n_j),
        in_specs=[
            # Resident across j (index_map ignores j -> no re-DMA).
            pl.BlockSpec((None, S, D), lambda b, j: (b, 0, 0)),
            pl.BlockSpec((None, D, mid_pad), lambda b, j: (b, 0, 0)),
            pl.BlockSpec((None, 1, mid_pad), lambda b, j: (b, 0, 0)),
            # Streamed along j (the dominant HBM traffic; double-buffered).
            pl.BlockSpec((None, mid_pad, tn), lambda b, j: (b, 0, j)),
            pl.BlockSpec((None, 1, tn), lambda b, j: (b, 0, j)),
        ],
        out_specs=pl.BlockSpec((None, S, tn), lambda b, j: (b, 0, j)),
        compiler_params=pltpu.CompilerParams(
            # Both axes independent (h is recomputed per tile) -> full
            # load-balance across v7x's two TensorCores; no-op on v5e/v6e.
            dimension_semantics=("parallel", "parallel"),
            vmem_limit_bytes=48 * 1024 * 1024,
        ),
    )(wte_all, w1_all, b1_all, w2_all, b2_all)


# -----------------------------------------------------------------------------
# Model: parameter init + get_prompt (forward-pass semantics of the task path)
# -----------------------------------------------------------------------------
class T5tdkPromptPallas:
    def __init__(
        self,
        key,
        task_sequence_length=8,
        n_embd=32,
        task_mid_dim=32,
        match_n_layer=2,
        match_n_head=4,
        match_n_embd=8,
        param_dtype=jnp.bfloat16,   # weight storage/stream dtype (f32 accumulate)
    ):
        self.task_sequence_length = task_sequence_length
        self.n_embd = n_embd
        self.task_mid_dim = task_mid_dim
        self.match_n_layer = match_n_layer
        self.match_n_head = match_n_head
        self.match_n_embd = match_n_embd
        self.out_dim = match_n_layer * 2 * match_n_head * match_n_embd
        self.param_dtype = param_dtype

        # task_input_tokens buffer (arange, like register_buffer in torch).
        # NOTE: Embedding(arange(S)) == the wte table itself, so no gather is
        # needed in the forward path.
        self.task_input_tokens = jnp.arange(task_sequence_length, dtype=jnp.int32)

        def init_branch(k):
            k = jax.random.split(k, 5)
            wte = (jax.random.normal(k[0], (task_sequence_length, n_embd), jnp.float32)
                   * 0.02).astype(param_dtype)
            w1 = (jax.random.normal(k[1], (n_embd, task_mid_dim), jnp.float32)
                  * (1.0 / np.sqrt(n_embd))).astype(param_dtype)
            b1 = jax.random.normal(k[2], (1, task_mid_dim), jnp.float32) * 0.01
            w2 = (jax.random.normal(k[3], (task_mid_dim, self.out_dim), jnp.float32)
                  * (1.0 / np.sqrt(task_mid_dim))).astype(param_dtype)
            b2 = jax.random.normal(k[4], (1, self.out_dim), jnp.float32) * 0.01
            return dict(wte=wte, w1=w1, b1=b1, w2=w2, b2=b2)

        k_enc, k_dec, k_cross = jax.random.split(key, 3)
        self.params = {
            "enc": init_branch(k_enc),
            "dec": init_branch(k_dec),
            "cross": init_branch(k_cross),
        }

        # --- Stacked, sublane-padded parameter tensors for the fused kernel --
        # Pad the hidden dim (task_mid_dim) only up to a multiple of 8
        # (sublane).  Full-extent blocks satisfy the (8,128) rule, and the
        # old x128 padding would inflate w2 bytes/MACs 4x for small mid.
        # Zero padding is exact: padded h cols are tanh(0)=0, matching w2
        # rows (and b1 cols) are 0.
        mid = task_mid_dim
        mid_pad = ((mid + 7) // 8) * 8
        self.mid_pad = mid_pad

        def pad_mid(a, axis):
            if mid_pad == mid:
                return a
            pad = [(0, 0)] * a.ndim
            pad[axis] = (0, mid_pad - mid)
            return jnp.pad(a, pad)

        order = ("enc", "dec", "cross")
        self.wte_all = jnp.stack([self.params[n]["wte"] for n in order])
        self.w1_all = jnp.stack([pad_mid(self.params[n]["w1"], 1) for n in order])
        self.b1_all = jnp.stack([pad_mid(self.params[n]["b1"], 1) for n in order])
        self.w2_all = jnp.stack([pad_mid(self.params[n]["w2"], 0) for n in order])
        self.b2_all = jnp.stack([self.params[n]["b2"] for n in order])

    # -------------------------------------------------------------------------
    def _expand_branch(self, branch_out, bsz, broadcast_batch=True):
        """[S, out_dim] -> list of L tensors of shape (2, bsz, H, S, Dk).

        Matches torch's view(bsz, S, 2L, H, Dk).permute([2,0,3,1,4]).split(2),
        broadcasting the (identical-per-sample) batch dim AFTER the permute so
        the transpose only touches the small per-sequence result.
        # TODO(synk): if the downstream frozen-T5 attention accepts a size-1
        # batch dim, pass broadcast_batch=False to skip the O(bsz) copy.
        """
        S = self.task_sequence_length
        L, H, Dk = self.match_n_layer, self.match_n_head, self.match_n_embd
        pkv = branch_out.reshape(S, 2 * L, H, Dk)
        pkv = jnp.transpose(pkv, (1, 2, 0, 3))                     # (2L, H, S, Dk)
        b = bsz if broadcast_batch else 1
        pkv = jnp.broadcast_to(pkv[:, None], (2 * L, b, H, S, Dk))
        return [pkv[2 * l: 2 * l + 2] for l in range(L)]

    def get_prompt(self, bsz, sample_size=1, broadcast_batch=True):
        old_bsz = bsz
        bsz = bsz * sample_size
        S = self.task_sequence_length

        # One fused Pallas call computes all three batch-invariant MLPs.
        out3 = fused_prompt_mlp(
            self.wte_all, self.w1_all, self.b1_all, self.w2_all, self.b2_all
        )  # (3, S, out_dim) f32

        enc_list = self._expand_branch(out3[0], old_bsz, broadcast_batch)
        dec_list = self._expand_branch(out3[1], bsz, broadcast_batch)
        cross_list = self._expand_branch(out3[2], bsz, broadcast_batch)

        result = []
        for i in range(self.match_n_layer):
            kv_enc, kv_dec, kv_cross = enc_list[i], dec_list[i], cross_list[i]
            temp = {
                "encoder_prompt": {
                    "prev_key": kv_enc[0],
                    "prev_value": kv_enc[1],
                    "prev_key_padding_mask": jnp.zeros((old_bsz, S), dtype=jnp.bool_),
                },
                "decoder_prompt": {
                    "prev_key": kv_dec[0],
                    "prev_value": kv_dec[1],
                    "prev_key_padding_mask": jnp.zeros((bsz, S), dtype=jnp.bool_),
                },
                "cross_attention_prompt": {
                    "prev_key": kv_cross[0],
                    "prev_value": kv_cross[1],
                    "prev_key_padding_mask": jnp.zeros((bsz, S), dtype=jnp.bool_),
                },
            }
            result.append(temp)
        return result

    def forward(self, ques_input_ids, ques_attention_mask):
        bsz = ques_input_ids.shape[0]
        past_prompt = self.get_prompt(bsz=bsz)
        # TODO(synk): frozen T5 backbone forward (loss) + knowledge-prompt
        # domain_loss are not reproduced here; return the computed prompts.
        return {"past_prompt": past_prompt, "loss": None, "domain_loss": None}


# -----------------------------------------------------------------------------
# Pure-JAX references (f32) for correctness checking against the bf16 weights.
# -----------------------------------------------------------------------------
def _ref_mlp(x, p):
    x = x.astype(jnp.float32)
    h = jnp.tanh(x @ p["w1"].astype(jnp.float32) + p["b1"].astype(jnp.float32))
    return h @ p["w2"].astype(jnp.float32) + p["b2"].astype(jnp.float32)


def _ref_branch_full(p, bsz, S, L, H, Dk, tokens):
    """Original (batch-expanded) torch semantics in pure JAX."""
    tok = jnp.broadcast_to(tokens[None, :], (bsz, S))
    x = jnp.take(p["wte"], tok, axis=0)                  # (bsz, S, D)
    y = _ref_mlp(x.reshape(bsz * S, -1), p).reshape(bsz, S, 2 * L, H, Dk)
    y = jnp.transpose(y, (2, 0, 3, 1, 4))                # (2L, bsz, H, S, Dk)
    return y


if __name__ == "__main__":
    key = jax.random.PRNGKey(0)
    k_model, k_ids = jax.random.split(key)

    # Small, consistent shapes:
    #   bsz=2, seq=8 (question tokens), task_sequence_length=8, n_embd=32,
    #   task_mid_dim=32, num_decoder_layers=2, num_heads=4, d_kv=8  (O=128)
    model = T5tdkPromptPallas(
        k_model,
        task_sequence_length=8,
        n_embd=32,
        task_mid_dim=32,
        match_n_layer=2,
        match_n_head=4,
        match_n_embd=8,
    )

    bsz, q_seq = 2, 8
    ques_input_ids = jax.random.randint(k_ids, (bsz, q_seq), 0, 100, dtype=jnp.int32)
    ques_attention_mask = jnp.ones((bsz, q_seq), dtype=jnp.int32)

    out = model.forward(ques_input_ids, ques_attention_mask)
    jax.block_until_ready(out["past_prompt"])

    # bf16 weight streaming: loosen tolerances vs f32 references.
    RTOL, ATOL = 3e-2, 3e-2

    # --- Check 1: fused Pallas MLP vs pure-JAX reference per branch ----------
    fused = fused_prompt_mlp(
        model.wte_all, model.w1_all, model.b1_all, model.w2_all, model.b2_all
    )
    jax.block_until_ready(fused)
    for bi, name in enumerate(("enc", "dec", "cross")):
        p = model.params[name]
        want = _ref_mlp(p["wte"], p)                     # [S, out_dim] f32
        np.testing.assert_allclose(
            np.asarray(fused[bi], dtype=np.float32),
            np.asarray(want, dtype=np.float32),
            rtol=RTOL, atol=ATOL,
        )

    # --- Check 2: full get_prompt output vs original batch-expanded semantics
    S, L, H, Dk = 8, 2, 4, 8
    ref_enc = _ref_branch_full(
        model.params["enc"], bsz, S, L, H, Dk, model.task_input_tokens
    )
    got_pk = out["past_prompt"][0]["encoder_prompt"]["prev_key"]
    got_pv = out["past_prompt"][0]["encoder_prompt"]["prev_value"]
    np.testing.assert_allclose(np.asarray(got_pk, dtype=np.float32),
                               np.asarray(ref_enc[0], dtype=np.float32),
                               rtol=RTOL, atol=ATOL)
    np.testing.assert_allclose(np.asarray(got_pv, dtype=np.float32),
                               np.asarray(ref_enc[1], dtype=np.float32),
                               rtol=RTOL, atol=ATOL)

    # Shape checks: prev_key / prev_value are (bsz, n_head, task_seq, d_kv)
    assert got_pk.shape == (bsz, 4, 8, 8), got_pk.shape
    assert out["past_prompt"][1]["cross_attention_prompt"]["prev_value"].shape == (
        bsz, 4, 8, 8,
    )

    print("KERNEL_OK")
</pallas_src>

<mosaic_0001>
module attributes {stable_mosaic.version = 11 : i64} {
  func.func @_fused_prompt_mlp_kernel(%arg0: i32, %arg1: i32, %arg2: memref<1x8x32xbf16, #tpu.memory_space<vmem>>, %arg3: memref<1x32x32xbf16, #tpu.memory_space<vmem>>, %arg4: memref<1x1x32xf32, #tpu.memory_space<vmem>>, %arg5: memref<1x32x128xbf16, #tpu.memory_space<vmem>>, %arg6: memref<1x1x128xf32, #tpu.memory_space<vmem>>, %arg7: memref<1x8x128xf32, #tpu.memory_space<vmem>>) attributes {dimension_semantics = [#tpu.dimension_semantics<parallel>, #tpu.dimension_semantics<parallel>], iteration_bounds = array<i64: 3, 1>, scalar_prefetch = 0 : i64, scratch_operands = 0 : i64, tpu.core_type = #tpu.core_type<tc>, window_params = [{transform_indices = @transform_0, window_bounds = array<i64: 1, 8, 32>}, {transform_indices = @transform_1, window_bounds = array<i64: 1, 32, 32>}, {transform_indices = @transform_2, window_bounds = array<i64: 1, 1, 32>}, {transform_indices = @transform_3, window_bounds = array<i64: 1, 32, 128>}, {transform_indices = @transform_4, window_bounds = array<i64: 1, 1, 128>}, {transform_indices = @transform_5, window_bounds = array<i64: 1, 8, 128>}]} {
    %c0 = arith.constant 0 : index
    %c0_0 = arith.constant 0 : index
    %c0_1 = arith.constant 0 : index
    %0 = vector.load %arg2[%c0, %c0_0, %c0_1] : memref<1x8x32xbf16, #tpu.memory_space<vmem>>, vector<1x8x32xbf16>
    %1 = vector.shape_cast %0 : vector<1x8x32xbf16> to vector<8x32xbf16>
    %c0_2 = arith.constant 0 : index
    %c0_3 = arith.constant 0 : index
    %c0_4 = arith.constant 0 : index
    %2 = vector.load %arg3[%c0_2, %c0_3, %c0_4] : memref<1x32x32xbf16, #tpu.memory_space<vmem>>, vector<1x32x32xbf16>
    %3 = vector.shape_cast %2 : vector<1x32x32xbf16> to vector<32x32xbf16>
    %cst = arith.constant dense<0.000000e+00> : vector<8x32xf32>
    %4 = tpu.matmul %1, %3, %cst {dimension_numbers = #tpu.dot_dimension_numbers<[1], [0], [0], [1], [0, 0, 1, 1], [], []>} : vector<8x32xbf16>, vector<32x32xbf16>, vector<8x32xf32> -> vector<8x32xf32>
    %c0_5 = arith.constant 0 : index
    %c0_6 = arith.constant 0 : index
    %c0_7 = arith.constant 0 : index
    %5 = vector.load %arg4[%c0_5, %c0_6, %c0_7] : memref<1x1x32xf32, #tpu.memory_space<vmem>>, vector<1x1x32xf32>
    %6 = vector.shape_cast %5 : vector<1x1x32xf32> to vector<1x32xf32>
    %7 = vector.broadcast %6 : vector<1x32xf32> to vector<8x32xf32>
    %8 = arith.addf %4, %7 : vector<8x32xf32>
    %9 = math.tanh %8 : vector<8x32xf32>
    %10 = arith.truncf %9 : vector<8x32xf32> to vector<8x32xbf16>
    %c0_8 = arith.constant 0 : index
    %c0_9 = arith.constant 0 : index
    %c0_10 = arith.constant 0 : index
    %11 = vector.load %arg5[%c0_8, %c0_9, %c0_10] : memref<1x32x128xbf16, #tpu.memory_space<vmem>>, vector<1x32x128xbf16>
    %12 = vector.shape_cast %11 : vector<1x32x128xbf16> to vector<32x128xbf16>
    %cst_11 = arith.constant dense<0.000000e+00> : vector<8x128xf32>
    %13 = tpu.matmul %10, %12, %cst_11 {dimension_numbers = #tpu.dot_dimension_numbers<[1], [0], [0], [1], [0, 0, 1, 1], [], []>} : vector<8x32xbf16>, vector<32x128xbf16>, vector<8x128xf32> -> vector<8x128xf32>
    %c0_12 = arith.constant 0 : index
    %c0_13 = arith.constant 0 : index
    %c0_14 = arith.constant 0 : index
    %14 = vector.load %arg6[%c0_12, %c0_13, %c0_14] : memref<1x1x128xf32, #tpu.memory_space<vmem>>, vector<1x1x128xf32>
    %15 = vector.shape_cast %14 : vector<1x1x128xf32> to vector<1x128xf32>
    %16 = vector.broadcast %15 : vector<1x128xf32> to vector<8x128xf32>
    %17 = arith.addf %13, %16 : vector<8x128xf32>
    %c0_15 = arith.constant 0 : index
    %c0_16 = arith.constant 0 : index
    %c0_17 = arith.constant 0 : index
    %18 = vector.load %arg7[%c0_15, %c0_16, %c0_17] : memref<1x8x128xf32, #tpu.memory_space<vmem>>, vector<1x8x128xf32>
    %19 = vector.shape_cast %18 : vector<1x8x128xf32> to vector<8x128xf32>
    %20 = vector.shape_cast %17 : vector<8x128xf32> to vector<1x8x128xf32>
    tpu.vector_store %arg7[%c0_15, %c0_16, %c0_17], %20 {strides = array<i32>} : memref<1x8x128xf32, #tpu.memory_space<vmem>>, vector<1x8x128xf32>,
    return
  }
  func.func @transform_0(%arg0: i32, %arg1: i32) -> (i32, i32, i32) {
    %c0_i32 = arith.constant 0 : i32
    %c0_i32_0 = arith.constant 0 : i32
    %c0_i32_1 = arith.constant 0 : i32
    return %arg0, %c0_i32, %c0_i32_0 : i32, i32, i32
  }
  func.func @transform_1(%arg0: i32, %arg1: i32) -> (i32, i32, i32) {
    %c0_i32 = arith.constant 0 : i32
    %c0_i32_0 = arith.constant 0 : i32
    %c0_i32_1 = arith.constant 0 : i32
    return %arg0, %c0_i32, %c0_i32_0 : i32, i32, i32
  }
  func.func @transform_2(%arg0: i32, %arg1: i32) -> (i32, i32, i32) {
    %c0_i32 = arith.constant 0 : i32
    %c0_i32_0 = arith.constant 0 : i32
    %c0_i32_1 = arith.constant 0 : i32
    return %arg0, %c0_i32, %c0_i32_0 : i32, i32, i32
  }
  func.func @transform_3(%arg0: i32, %arg1: i32) -> (i32, i32, i32) {
    %c0_i32 = arith.constant 0 : i32
    %c0_i32_0 = arith.constant 0 : i32
    return %arg0, %c0_i32, %arg1 : i32, i32, i32
  }
  func.func @transform_4(%arg0: i32, %arg1: i32) -> (i32, i32, i32) {
    %c0_i32 = arith.constant 0 : i32
    %c0_i32_0 = arith.constant 0 : i32
    return %arg0, %c0_i32, %arg1 : i32, i32, i32
  }
  func.func @transform_5(%arg0: i32, %arg1: i32) -> (i32, i32, i32) {
    %c0_i32 = arith.constant 0 : i32
    %c0_i32_0 = arith.constant 0 : i32
    return %arg0, %c0_i32, %arg1 : i32, i32, i32
  }
}

</mosaic_0001>

<bundles_post_ra>
// kernel: tpu_custom_call.1
= control target key start
LH: loop header
LB: loop body
LE: loop exit
PB: predicated region body
PF: predicated region fallthrough
CT: control target
= control target key end

     0   :  { %s1230_s0 = inlined_call_operand.hbm [shape: bf16[3,8,32], index: 0, kind: input, shape index: {}]   ;;  %s1231_s1 = inlined_call_operand.hbm [shape: bf16[3,32,32], index: 1, kind: input, shape index: {}]   ;;  %s1232_s2 = inlined_call_operand.vmem [shape: f32[3,1,32], index: 2, kind: input, shape index: {}]   ;;  %s1233_s3 = inlined_call_operand.hbm [shape: bf16[3,32,128], index: 3, kind: input, shape index: {}]   ;;  %s1234_s4 = inlined_call_operand.vmem [shape: f32[3,1,128], index: 4, kind: input, shape index: {}]   ;;  %s1235_s5 = inlined_call_operand.hbm [shape: f32[3,8,128], index: 5, kind: output, shape index: {}]  }
   0x1   :  { %1241 = sst [smem:[#allocation17_spill]] %s1231_s1 }
   0x2   :  { %10 = vsyncpa [#allocation3], 0 }
   0x3   :  { %12 = vsyncpa [#allocation3 + $0x1], 0 }
   0x4   :  { %13 = vsyncpa [#allocation6], 0 }
   0x5   :  { %15 = vsyncpa [#allocation6 + $0x1], 0 }
   0x6   :  { %16 = vsyncpa [#allocation4], 0 }
   0x7   :  { %18 = vsyncpa [#allocation4 + $0x1], 0  ;;  %s1014_s18 = smov 0   ;;  %s1016_s19 = smov 0  }
   0x8   :  { %s1018_s20 = smov 0   ;;  %s1020_s21 = smov 0  }
   0x9   :  { %s1022_s22 = smov 0   ;;  %s1024_s23 = smov 0  }
   0xa LB: > { %1242 = sst [smem:[#allocation12_spill]] %s954_s18  ;;  %s1045_s24 = sadd.s32 4294967295, %s974_s23   ;;  %s974_s23 = sphi %s1024_s23, %s24_s23   ;;  %s970_s22 = sphi %s1022_s22, %s1263_s22   ;;  %s966_s21 = sphi %s1020_s21, %s1262_s21   ;;  %s962_s20 = sphi %s1018_s20, %s1258_s20   ;;  %s958_s19 = sphi %s1016_s19, %s1261_s19   ;;  %s954_s18 = sphi %s1014_s18, %s1260_s18  }
   0xb   : > { %1243 = sst [smem:[#allocation13_spill]] %s962_s20  ;;  %s672_s25 = sadd.s32 4294967294, %s974_s23  }
   0xc   : > { %s36_s26 = sadd.s32 1, %s970_s22  ;;  %s43_s27 = sadd.s32 1, %s962_s20 }
   0xd   : > { %p38_p0 = scmp.ge.s32.totalorder %s36_s26, 3  ;;  %p50_p1 = scmp.ne.s32.totalorder %s962_s20, %s958_s19 }
   0xe   : > { %p51_p2 = scmp.eq.s32.totalorder %s974_s23, 0  ;;  %p56_p3 = scmp.ne.s32.totalorder %s958_s19, %s954_s18 }
   0xf   : > { %s1265_s26 = smov (%p38_p0, %s36_s26), 0  ;;  %p57_p5 = scmp.eq.s32.totalorder %s1045_s24, 0 }
  0x10   : > { %1244 = sst [smem:[#allocation14_spill]] %s1265_s26  ;;  %p1057_p4 = por %p51_p2, %p50_p1 }
  0x11   : > { %s40_s29 = ssub.s32 %s970_s22, %s1265_s26  ;;  %p190_p6 = scmp.eq.s32.totalorder %s1045_s24, 2 }
  0x12   : > { %p41_p7 = scmp.eq.s32.totalorder %s40_s29, 0  ;;  %p1065_p8 = por %p57_p5, %p56_p3 }
  0x13   : > { %p1069_p9 = por %p190_p6, %p50_p1  ;;  %p196_p10 = scmp.eq.s32.totalorder %s672_s25, 2 }
  0x14   : > { %s1074_s7 = scalar_select %p41_p7, %s962_s20, %s43_s27  }
  0x15   : > { %p1076_p11 = por %p196_p10, %p56_p3  ;;  %p746_p12 = scmp.lt.s32.totalorder %s974_s23, 3 }
  0x16   : > { %1248 = sst [smem:[#allocation15_spill]] %s1074_s7  ;;  %s1082_s9 = sand.u32 1, %s962_s20  }
  0x17   : > { %s1249_s8 = scalar_select %p1076_p11, 1, 0 }
  0x18   : > { %s234_s10 = sand.u32 1, %s974_s23   ;;  %s677_s11 = sshll.u32 %s1082_s9, 4 }
  0x19   : > { %1250 = sst [smem:[#allocation16_spill]] %s1249_s8  ;;  %p1088_p13 = pnand %p746_p12, %p1057_p4 }
  0x1a   : > { %s700_s13 = sshll.u32 %s970_s22, 8  ;;  %s1252_s1 = sld [smem:[#allocation17_spill]] }
  0x1b   : > { %s238_s17 = scalar_lea.vmem [#allocation5], %s677_s11  ;;  %s1098_s27 = scalar_lea.sflag [#allocation6], %s234_s10 }
  0x1c   : > { %s245_s25 = sshll.u32 %s238_s17, 4  ;;  %p808_p0 = pneg %p1088_p13  ;;  %s246_s25 = int_to_ptr.vmem [resolvable:$true] %s245_s25 }
  0x1d   : > { %s819_s28 = scalar_lea.vmem %s246_s25, 256  ;;  %s976_s29 = smov [#allocation5]  }
  0x1e   : > { %p820_p1 = scmp.ne.s32.totalorder %s246_s25, %s819_s28  ;;  %s824_s26 = sshll.u32 %s976_s29, 4  ;;  %s825_s26 = int_to_ptr.vmem [resolvable:$false] %s824_s26 }
  0x1f   : > { %s826_s7 = scalar_lea.vmem %s825_s26, 512  ;;  %p827_p4 = scmp.lt.s32.totalorder %s246_s25, %s825_s26 }
  0x20   : > { %s244_s16 = scalar_lea.hbm %s1252_s1, %s700_s13  ;;  %p822_p2 = pnand %p820_p1, %p808_p0 }
  0x21   : > { %p828_p5 = scmp.lt.s32.totalorder %s826_s7, %s819_s28 }
  0x22   : > { %p823_p3 = pneg %p822_p2 }
  0x23   : > { %p829_p6 = por %p828_p5, %p827_p4 }
  0x25   : > { %p830_p7 = pnand %p829_p6, %p823_p3 }
  0x27   : > { %833 = shalt.err (!%p830_p7)
}
  0x28   : > { %s1240_s14 = smov 64   ;;  %s978_s10 = smov 4  }
  0x29   : > { %738 = dma.hbm_to_vmem [thread:$0]  (!%p1088_p13), %s244_s16, 256, %s246_s25, %s1098_s27, %s1240_s14, %s1240_s14, %s978_s10  }
  0x2a   : > { %s1114_s15 = scalar_lea.hbm %s1233_s3, %s700_s13  ;;  %p683_p10 = scmp.ge.s32.totalorder %s974_s23, 1 }
  0x2b   : > { %s265_s17 = scalar_lea.vmem [#allocation7], %s677_s11  ;;  %p290_p12 = scmp.lt.s32.totalorder %s974_s23, 4 }
  0x2c   : > { %s273_s28 = sshll.u32 %s265_s17, 4  ;;  %s675_s1 = sshll.u32 %s1082_s9, 2  ;;  %s1129_s28 = int_to_ptr.vmem [resolvable:$true] %s273_s28 }
  0x2d   : > { %p1120_p1 = pnand %p683_p10, %p290_p12  ;;  %s676_s20 = sshll.u32 %s970_s22, 6 }
  0x2e   : > { %s225_s16 = scalar_lea.hbm %s1230_s0, %s676_s20  ;;  %s220_s13 = scalar_lea.vmem [#allocation2], %s675_s1 }
  0x2f   : > { %s227_s25 = sshll.u32 %s220_s13, 4  ;;  %s217_s26 = scalar_lea.sflag [#allocation3], %s1082_s9  ;;  %s228_s25 = int_to_ptr.vmem [resolvable:$true] %s227_s25 }
  0x30   : > { %s847_s7 = scalar_lea.vmem %s228_s25, 64  ;;  %s979_s11 = smov [#allocation2]  }
  0x31   : > { %p848_p2 = scmp.ne.s32.totalorder %s228_s25, %s847_s7  ;;  %s852_s17 = sshll.u32 %s979_s11, 4  ;;  %s853_s17 = int_to_ptr.vmem [resolvable:$false] %s852_s17 }
  0x32   : > { %s854_s14 = scalar_lea.vmem %s853_s17, 128  ;;  %p855_p5 = scmp.lt.s32.totalorder %s228_s25, %s853_s17 }
  0x33   : > { %p850_p3 = pnand %p848_p2, %p808_p0  ;;  %p856_p6 = scmp.lt.s32.totalorder %s854_s14, %s847_s7 }
  0x35   : > { %p851_p4 = pneg %p850_p3  ;;  %p857_p7 = por %p856_p6, %p855_p5 }
  0x37   : > { %p858_p10 = pnand %p857_p7, %p851_p4 }
  0x39   : > { %861 = shalt.err (!%p858_p10)
}
  0x3a   : > { %735 = dma.hbm_to_vmem [thread:$0]  (!%p1088_p13), %s225_s16, 64, %s228_s25, %s217_s26  }
  0x3b   : > { %s875_s1 = scalar_lea.vmem %s1129_s28, 256  ;;  %s980_s18 = smov [#allocation7]  }
  0x3c   : > { %p876_p12 = scmp.ne.s32.totalorder %s1129_s28, %s875_s1  ;;  %s880_s20 = sshll.u32 %s980_s18, 4  ;;  %s881_s20 = int_to_ptr.vmem [resolvable:$false] %s880_s20 }
  0x3d   : > { %s882_s8 = scalar_lea.vmem %s881_s20, 512  ;;  %p883_p5 = scmp.lt.s32.totalorder %s1129_s28, %s881_s20 }
  0x3e   : > { %p878_p2 = pnand %p876_p12, %p808_p0  ;;  %p884_p4 = scmp.lt.s32.totalorder %s882_s8, %s875_s1 }
  0x40   : > { %p879_p3 = pneg %p878_p2  ;;  %p885_p6 = por %p884_p4, %p883_p5 }
  0x42   : > { %p886_p7 = pnand %p885_p6, %p879_p3 }
  0x44   : > { %889 = shalt.err (!%p886_p7)
}
  0x45   : > { %s1254_s9 = smov 64   ;;  %294 = sbr.rel (%p1120_p1) target bundleno = 508 (0x1fc), region = 40 }
  0x46   : > { %741 = dma.hbm_to_vmem [thread:$0]  (!%p1088_p13), %s1114_s15, 256, %s1129_s28, %s1098_s27, %s1254_s9, %s1254_s9, %s978_s10  }
  0x47   : > { %s1154_s14 = sand.u32 (!%p1120_p1), 1, %s958_s19  }
  0x48   : > { %s684_s16 = sshll.u32 (!%p1120_p1), %s1154_s14, 2  ;;  %s297_s13 = scalar_lea.sflag (!%p1120_p1), [#allocation3], %s1154_s14 }
  0x49   : > { %s300_s25 = scalar_lea.vmem (!%p1120_p1), [#allocation2], %s684_s16 }
  0x4a   : > { %941 = dma.done.wait (%p1065_p8), %s297_s13, 64  }
  0x4b   : > { %943 = vsyncadd (%p1065_p8), %s297_s13, 4294967232  ;;  %s305_s12 = sand.u32 1, %s1045_s24   ;;  %s685_s27 = sshll.u32 %s1154_s14, 4 }
  0x4c   : > { %s306_s10 = scalar_lea.sflag [#allocation6], %s305_s12  ;;  %s309_s15 = scalar_lea.vmem [#allocation5], %s685_s27 }
  0x4d   : > { %945 = dma.done.wait (%p1065_p8), %s306_s10, 512  }
  0x4e   : > { %947 = vsyncadd (%p1065_p8), %s306_s10, 4294966784  ;;  %v981_v0 = vmov 0.0   ;;  %vm982_vm0 = vmmov 0   ;;  %v800_v1 = vld [vmem:[%s309_s15 + $0x8] sm:$0xff]   ;;  %v801_v2 = vld [vmem:[%s309_s15] sm:$0xff]   ;;  %vm398_vm1 = vcmask 261120  }
  0x4f   : > { %708 = vmatprep.subr.bf16.mxu0 %v981_v0  ;;  %712 = vmatprep.mubr.msk.bf16.mxu0 %vm982_vm0, %v981_v0  ;;  %v374_v3 = vld [vmem:[%s300_s25] sm:$0xf]  ;;  %s318_s24 = scalar_lea.vmem [#allocation7], %s685_s27  ;;  %p364_p8 = scmp.lt.s32.totalorder %s966_s21, 2 }
  0x50   : > { %716 = vmatprep.subr.bf16.mxu1 %v981_v0  ;;  %720 = vmatprep.mubr.msk.bf16.mxu1 %vm982_vm0, %v981_v0  ;;  %v802_v4 = vld [vmem:[%s318_s24 + $0x8] sm:$0xff]   ;;  %v803_v5 = vld [vmem:[%s318_s24] sm:$0xff]   ;;  %s687_s7 = sshll.u32 %s1154_s14, 3  ;;  %s697_s18 = sshll.u32 %s966_s21, 7 }
  0x51   : > { %709 = vmatpush3.bf16.msra.mxu0 %v800_v1  ;;  %717 = vmatpush3.bf16.msra.mxu1 %v802_v4  ;;  %s365_s30 = scalar_select %p364_p8, %s966_s21, 2 }
  0x52   : > { %710 = vmatprep.subr.bf16.mxu0 %v981_v0  ;;  %718 = vmatprep.subr.bf16.mxu1 %v981_v0  ;;  %s363_s20 = scalar_lea.vmem [#allocation8], %s687_s7  ;;  %s1183_s13 = scalar_lea.hbm %s1235_s5, %s697_s18 }
  0x53   : > { %s366_s26 = scalar_lea.vmem %s1232_s2, %s365_s30  ;;  %s372_s1 = scalar_lea.vmem %s1234_s4, %s365_s30 }
  0x54   : > { %v688_v6 = vld [vmem:[%s366_s26] ss:$0 sm:$0xff]  ;;  %s526_s8 = sshll.u32 %s363_s20, 4  ;;  %s512_s25 = scalar_lea.sflag [#allocation4], %s1154_s14  ;;  %s1185_s8 = int_to_ptr.vmem [resolvable:$true] %s526_s8 }
  0x55   : > { %711 = vmatpush3.bf16.msra.mxu0 %v801_v2  ;;  %719 = vmatpush3.bf16.msra.mxu1 %v803_v5  ;;  %v692_v14 = vld [vmem:[%s372_s1] ss:$0 sm:$0xff]  ;;  %s890_s12 = scalar_lea.vmem %s1185_s8, 128  ;;  %s983_s21 = smov [#allocation8]  }
  0x56   : > { %p891_p13 = scmp.ne.s32.totalorder %s1185_s8, %s890_s12  ;;  %s894_s27 = sshll.u32 %s983_s21, 4  ;;  %s895_s27 = int_to_ptr.vmem [resolvable:$false] %s894_s27 }
  0x57   : > { %s896_s10 = scalar_lea.vmem %s895_s27, 256  ;;  %p897_p10 = scmp.lt.s32.totalorder %s1185_s8, %s895_s27 }
  0x58   : > { %713 = vmatmul.mubr.msk.bf16.vlgmr.msra.gmra.mxu0 %vm398_vm1, %v374_v3  ;;  %p892_p0 = pnand %p891_p13, %p1069_p9  ;;  %p898_p12 = scmp.lt.s32.totalorder %s896_s10, %s890_s12 }
  0x5a   : > { %p893_p1 = pneg %p892_p0  ;;  %p899_p2 = por %p898_p12, %p897_p10 }
  0x5c   : > { %p900_p3 = pnand %p899_p2, %p893_p1 }
 0x118   : > { %v436_v7 = vpop.f32.mrf.mxu0 }
 0x119   : > { %v437_v8 = vadd.f32 %v688_v6, %v436_v7 }
 0x11a   : > { %v714_v9 = vpop.f32.mrf.mxu0 }
 0x11b   : > { %804 = vtanh.f32 %v437_v8 }
 0x11c   : > { %v439_v10 = vpop.f32.mrf.mxu0 }
 0x11e   : > { %v715_v11 = vpop.f32.mrf.mxu0 }
 0x128   : > { %v805_v12 = vpop.eup %804 }
 0x129   : > { %v443_v13 = vpack.c.bf16 %v805_v12, %v805_v12 }
 0x12b   : > { %721 = vmatmul.mubr.msk.bf16.vlgmr.msra.gmra.mxu1 %vm398_vm1, %v443_v13 }
 0x1eb   : > { %v504_v15 = vpop.f32.mrf.mxu1 }
 0x1ec   : > { %v505_v16 = vadd.f32 %v692_v14, %v504_v15 }
 0x1ed   : > { %v722_v17 = vpop.f32.mrf.mxu1 }
 0x1ee   : > { %510 = vst [vmem:[%s363_s20] sm:$0xff] %v505_v16 }
 0x1ef   : > { %v507_v18 = vpop.f32.mrf.mxu1 }
 0x1f0   : > { %903 = shalt.err (!%p900_p3)
}
 0x1f1   : > { %s904_s15 = scalar_lea.hbm %s1183_s13, 128  ;;  %s908_s30 = scalar_lea.hbm %s1235_s5, 384 }
 0x1f2   : > { %p905_p5 = scmp.ne.s32.totalorder %s1183_s13, %s904_s15  ;;  %p909_p7 = scmp.lt.s32.totalorder %s1183_s13, %s1235_s5 }
 0x1f3   : > { %p910_p8 = scmp.lt.s32.totalorder %s908_s30, %s904_s15 }
 0x1f4   : > { %p906_p4 = pnand %p905_p5, %p1069_p9 }
 0x1f5   : > { %p911_p13 = por %p910_p8, %p909_p7 }
 0x1f6   : > { %p907_p6 = pneg %p906_p4 }
 0x1f8   : > { %p912_p0 = pnand %p911_p13, %p907_p6 }
 0x1fa   : > { %915 = shalt.err (!%p912_p0)
}
 0x1fb   : > { %730 = dma.vmem_to_hbm [thread:$0]  (%p1069_p9), %s1185_s8, 128, %s1183_s13, %s512_s25   ;;  %v723_v19 = vpop.f32.mrf.mxu1 }
 0x1fc PF: > { %s1255_s26 = sld [smem:[#allocation12_spill]]  ;;  %p747_p1 = scmp.ge.s32.totalorder %s974_s23, 2 }
 0x1fe   : > { %p743_p10 = pnand %p747_p1, %p1076_p11 }
 0x200   : > { %p744_p12 = pneg %p743_p10 }
 0x202   : > { %s538_s11 = sand.u32 1, %s1255_s26  }
 0x203   : > { %s539_s17 = scalar_lea.sflag [#allocation4], %s538_s11 }
 0x204   : > { %949 = dma.done.wait (%p744_p12), %s539_s17, 128  }
 0x205   : > { %951 = vsyncadd (%p744_p12), %s539_s17, 4294967168  ;;  %s24_s23 = sadd.s32 1, %s974_s23   ;;  %s1257_s6 = sld [smem:[#allocation13_spill]] }
 0x206   : > { %p21_p2 = scmp.ge.s32.totalorder %s24_s23, 5   ;;  %s1258_s20 = sld [smem:[#allocation15_spill]] }
 0x207   : > { %s1259_s1 = sld [smem:[#allocation14_spill]]  ;;  %s1260_s18 = smov %s958_s19 }
 0x208   : > { %s1262_s21 = smov %s970_s22 }
 0x209   :  { %23 = sbr.rel (!%p21_p2) target bundleno = 10 (0xa), region = 115 }
 0x20b   : > { %s1261_s19 = smov %s1257_s6 }
 0x20d   : > { %s1263_s22 = smov %s1259_s1 }
 0x20e   :  { %544 = vsyncpa [#allocation3], 1 }
 0x20f   :  { %546 = vsyncpa [#allocation3 + $0x1], 1 }
 0x210   :  { %547 = vsyncpa [#allocation6], 1 }
 0x211   :  { %549 = vsyncpa [#allocation6 + $0x1], 1 }
 0x212   :  { %550 = vsyncpa [#allocation4], 1 }
 0x213   :  { %552 = vsyncpa [#allocation4 + $0x1], 1 }

</bundles_post_ra>
